<compile_context>
chip_gen: v5e
topology: v5e:2x2
jax: 0.10.0
libtpu: 0.0.40
codegen_flags: <defaults>
</compile_context>

<pallas_src>
import jax
import jax.numpy as jnp
from jax.experimental import pallas as pl
from jax.experimental.pallas import tpu as pltpu


def _cdiv(a, b):
    return (a + b - 1) // b


def _round_up(n, m):
    return ((n + m - 1) // m) * m


def safe_power_kernel(x_ref, fs_ref, w_ref, zc_ref, b_ref, out_ref, power_ref):
    # x_ref    : (TM, D)  f32 VMEM  row tile of (row-padded) input
    # fs_ref   : (1, TN)  f32 VMEM  column tile of precomputed final_sign
    # w_ref    : (1, D)   f32 VMEM  trainable exponents (out_dim == 1)
    # zc_ref   : (1, 1)   f32 SMEM  1.0 if any(weight == 0) else 0.0
    # b_ref    : (1, 1)   f32 SMEM  bias
    # out_ref  : (TM, TN) f32 VMEM  output tile (edge tiles masked on store)
    # power_ref: (TM, 1)  f32 VMEM  scratch, persists across the inner j axis
    j = pl.program_id(1)

    # Hoisted per-row power: recompute only when the row tile changes (j == 0).
    @pl.when(j == 0)
    def _():
        x = x_ref[...]                                    # (TM, D)
        w = w_ref[...]                                    # (1, D)
        log_x = jnp.log(jnp.maximum(jnp.abs(x), 1e-7))    # EUP
        # out_dim == 1: exact f32 lane-reduce on the XLU (keep off the MXU)
        z = jnp.sum(log_x * w, axis=1, keepdims=True)     # (TM, 1)
        # torch: power_result -= 1 iff any(weight == 0)  (folded into zc scalar)
        power_ref[...] = jnp.exp(z) - zc_ref[0, 0]

    # Hot path: rank-1 outer product + bias -> one vmul + one vadd + one vst.
    out_ref[...] = power_ref[...] * fs_ref[...] + b_ref[0, 0]


def safe_power(x, weight, sign_param, bias, *, training=True,
               block_rows=512, block_cols=2048):
    """JAX wrapper reproducing SafePower.forward semantics (out_dim == 1)."""
    N, D = x.shape
    O = weight.shape[0]
    assert O == 1, "SafePower.forward broadcasting only works for out_dim == 1"

    x = x.astype(jnp.float32)
    w = weight.astype(jnp.float32).reshape(1, D)

    # Scalars / tiny vectors that are cheap outside the kernel:
    sf = jnp.clip((sign_param.astype(jnp.float32).reshape(()) + 3.0) / 6.0, 0.0, 1.0)
    if not training:                                       # static python flag
        sf = (sf > 0.5).astype(jnp.float32)
    final_sign = sf + (1.0 - sf) * jnp.sign(x[:, 0])       # (N,)
    zc2 = jnp.any(w == 0.0).astype(jnp.float32).reshape(1, 1)
    b2 = bias.astype(jnp.float32).reshape(1, 1)

    # Tile sizes: rows on sublanes (mult of 8, capped at ~N/2 so grid[0] >= 2
    # for v7x megacore sharding); cols lane-dense (mult of 128).
    tm = min(block_rows, _round_up(_cdiv(N, 2), 8))
    tn = min(block_cols, _round_up(N, 128))
    grid = (_cdiv(N, tm), _cdiv(N, tn))

    # Cheap INPUT-side padding only (N*D and N floats). The N^2 output is
    # emitted at its exact shape; Pallas masks the ragged edge tile stores.
    rows_pad = grid[0] * tm
    cols_pad = grid[1] * tn
    x_pad = jnp.pad(x, ((0, rows_pad - N), (0, 0)), constant_values=1.0)
    fs_row = jnp.pad(final_sign.reshape(1, N), ((0, 0), (0, cols_pad - N)))

    # Explicit scoped-VMEM budget: double-buffered output tile + inputs + slack.
    vmem_limit = 2 * (tm * tn * 4 + tm * D * 4 + tn * 4) + tm * 4 + (2 << 20)
    vmem_limit = int(max(vmem_limit, 32 * 1024 * 1024))    # <= v7x 64 MiB physical

    out = pl.pallas_call(
        safe_power_kernel,
        out_shape=jax.ShapeDtypeStruct((N, N), jnp.float32),
        grid_spec=pltpu.PrefetchScalarGridSpec(
            num_scalar_prefetch=0,
            grid=grid,
            in_specs=[
                pl.BlockSpec((tm, D), lambda i, j: (i, 0)),            # x row tile
                pl.BlockSpec((1, tn), lambda i, j: (0, j)),            # final_sign cols
                pl.BlockSpec((1, D), lambda i, j: (0, 0)),             # weight
                pl.BlockSpec(memory_space=pltpu.MemorySpace.SMEM),     # zero correction
                pl.BlockSpec(memory_space=pltpu.MemorySpace.SMEM),     # bias
            ],
            out_specs=pl.BlockSpec((tm, tn), lambda i, j: (i, j)),
            scratch_shapes=[pltpu.VMEM((tm, 1), jnp.float32)],         # per-row power
        ),
        compiler_params=pltpu.CompilerParams(
            # rows shard across TensorCores; inner col axis must stay sequential
            # because of the j == 0 scratch hoist.
            dimension_semantics=("parallel", "arbitrary"),
            vmem_limit_bytes=vmem_limit,
        ),
        cost_estimate=pl.CostEstimate(
            flops=2 * N * N,
            transcendentals=2 * N * D,
            bytes_accessed=4 * N * N + 4 * N * D,
        ),
    )(x_pad, fs_row, w, zc2, b2)

    # torch: (final_sign * power_result).unsqueeze(1) + bias  -> (N, 1, N)
    # (adding the unit middle dim is a free metadata reshape)
    return out.reshape(N, 1, N)


def safe_power_reference(x, weight, sign_param, bias, *, training=True):
    """Pure-JAX transcription of the PyTorch forward (for validation)."""
    x_abs = jnp.maximum(jnp.abs(x), 1e-7)
    input_signs = jnp.sign(x)
    log_x = jnp.log(x_abs)
    power_result = jnp.exp(jnp.sum(log_x[:, None, :] * weight[None, :, :], axis=-1))
    power_result = jnp.where(jnp.any(weight == 0.0), power_result - 1.0, power_result)
    sf = jnp.clip((sign_param + 3.0) / 6.0, 0.0, 1.0)
    if not training:
        sf = (sf > 0.5).astype(jnp.float32)
    final_sign = sf * jnp.ones_like(input_signs[:, 0]) + (1.0 - sf) * input_signs[:, 0]
    return (final_sign * power_result)[:, None, :] + bias


if __name__ == "__main__":
    key = jax.random.PRNGKey(0)
    kx, kw, kx2, kw2 = jax.random.split(key, 4)

    # Small case: single-tile grid, training mode, blended sign.
    N, D, O = 8, 4, 1
    x = jax.random.normal(kx, (N, D), dtype=jnp.float32)
    weight = jax.random.uniform(kw, (O, D), dtype=jnp.float32, minval=1.0, maxval=6.0)
    bias = jnp.zeros((O,), dtype=jnp.float32)
    sign_param = jnp.full((O,), 0.3, dtype=jnp.float32)

    out = jax.block_until_ready(safe_power(x, weight, sign_param, bias, training=True))
    ref = safe_power_reference(x, weight, sign_param, bias, training=True)
    assert out.shape == (N, 1, N), out.shape
    assert jnp.allclose(out, ref, rtol=1e-3, atol=1e-5)

    # Larger case: multi-tile grid with masked edge tiles on BOTH axes
    # (exact (N, N) output, no wrapper padding/slice), eval mode, zero-weight
    # correction branch, nonzero bias.
    N2, D2 = 200, 6
    x2 = jax.random.uniform(kx2, (N2, D2), dtype=jnp.float32, minval=-2.0, maxval=2.0)
    w2 = jax.random.uniform(kw2, (O, D2), dtype=jnp.float32, minval=1.0, maxval=6.0)
    w2 = w2.at[0, 0].set(0.0)                       # exercise the any(w == 0) path
    sp2 = jnp.full((O,), -1.0, dtype=jnp.float32)   # eval-thresholded -> odd symmetry
    b2 = jnp.full((O,), 0.25, dtype=jnp.float32)
    out2 = jax.block_until_ready(
        safe_power(x2, w2, sp2, b2, training=False, block_rows=64, block_cols=128))
    ref2 = safe_power_reference(x2, w2, sp2, b2, training=False)
    assert out2.shape == (N2, 1, N2), out2.shape
    assert jnp.allclose(out2, ref2, rtol=2e-3, atol=1e-5)

    print("KERNEL_OK")
</pallas_src>

<mosaic_0001>
module attributes {stable_mosaic.version = 11 : i64} {
  func.func @safe_power_kernel(%arg0: i32, %arg1: i32, %arg2: memref<8x4xf32, #tpu.memory_space<vmem>>, %arg3: memref<1x128xf32, #tpu.memory_space<vmem>>, %arg4: memref<1x4xf32, #tpu.memory_space<vmem>>, %arg5: memref<1x1xf32, #tpu.memory_space<smem>>, %arg6: memref<1x1xf32, #tpu.memory_space<smem>>, %arg7: memref<8x128xf32, #tpu.memory_space<vmem>>, %arg8: memref<8x1xf32, #tpu.memory_space<vmem>>) attributes {dimension_semantics = [#tpu.dimension_semantics<parallel>, #tpu.dimension_semantics<arbitrary>], iteration_bounds = array<i64: 1, 1>, scalar_prefetch = 0 : i64, scratch_operands = 1 : i64, tpu.core_type = #tpu.core_type<tc>, window_params = [{transform_indices = @transform_0, window_bounds = array<i64: 8, 4>}, {transform_indices = @transform_1, window_bounds = array<i64: 1, 128>}, {pipeline_mode = #tpu.pipeline_mode<synchronous>, transform_indices = @transform_2, window_bounds = array<i64: 1, 4>}, {transform_indices = @transform_3, window_bounds = array<i64: 1, 1>}, {transform_indices = @transform_4, window_bounds = array<i64: 1, 1>}, {transform_indices = @transform_5, window_bounds = array<i64: 8, 128>}]} {
    %c0_i32 = arith.constant 0 : i32
    %0 = arith.cmpi eq, %arg1, %c0_i32 : i32
    %1 = arith.extui %0 : i1 to i32
    %c0_i32_0 = arith.constant 0 : i32
    %2 = arith.cmpi ne, %1, %c0_i32_0 : i32
    scf.if %2 {
      %c0_8 = arith.constant 0 : index
      %c0_9 = arith.constant 0 : index
      %12 = vector.load %arg2[%c0_8, %c0_9] : memref<8x4xf32, #tpu.memory_space<vmem>>, vector<8x4xf32>
      %c0_10 = arith.constant 0 : index
      %c0_11 = arith.constant 0 : index
      %13 = vector.load %arg4[%c0_10, %c0_11] : memref<1x4xf32, #tpu.memory_space<vmem>>, vector<1x4xf32>
      %14 = math.absf %12 : vector<8x4xf32>
      %cst = arith.constant 1.000000e-07 : f32
      %15 = vector.broadcast %cst : f32 to vector<8x4xf32>
      %16 = arith.maximumf %14, %15 : vector<8x4xf32>
      %17 = math.log %16 : vector<8x4xf32>
      %18 = vector.broadcast %13 : vector<1x4xf32> to vector<8x4xf32>
      %19 = arith.mulf %17, %18 : vector<8x4xf32>
      %cst_12 = arith.constant dense<0.000000e+00> : vector<8xf32>
      %20 = vector.multi_reduction <add>, %19, %cst_12 [1] : vector<8x4xf32> to vector<8xf32>
      %21 = vector.shape_cast %20 : vector<8xf32> to vector<8x1xf32>
      %22 = math.exp %21 : vector<8x1xf32>
      %c0_13 = arith.constant 0 : index
      %c0_14 = arith.constant 0 : index
      %23 = memref.load %arg5[%c0_13, %c0_14] : memref<1x1xf32, #tpu.memory_space<smem>>
      %24 = vector.broadcast %23 : f32 to vector<8x1xf32>
      %25 = arith.subf %22, %24 : vector<8x1xf32>
      %c0_15 = arith.constant 0 : index
      %c0_16 = arith.constant 0 : index
      %26 = vector.load %arg8[%c0_15, %c0_16] : memref<8x1xf32, #tpu.memory_space<vmem>>, vector<8x1xf32>
      tpu.vector_store %arg8[%c0_15, %c0_16], %25 {strides = array<i32>} : memref<8x1xf32, #tpu.memory_space<vmem>>, vector<8x1xf32>,
    } else {
    }
    %c0 = arith.constant 0 : index
    %c0_1 = arith.constant 0 : index
    %3 = vector.load %arg8[%c0, %c0_1] : memref<8x1xf32, #tpu.memory_space<vmem>>, vector<8x1xf32>
    %c0_2 = arith.constant 0 : index
    %c0_3 = arith.constant 0 : index
    %4 = vector.load %arg3[%c0_2, %c0_3] : memref<1x128xf32, #tpu.memory_space<vmem>>, vector<1x128xf32>
    %5 = vector.broadcast %3 : vector<8x1xf32> to vector<8x128xf32>
    %6 = vector.broadcast %4 : vector<1x128xf32> to vector<8x128xf32>
    %7 = arith.mulf %5, %6 : vector<8x128xf32>
    %c0_4 = arith.constant 0 : index
    %c0_5 = arith.constant 0 : index
    %8 = memref.load %arg6[%c0_4, %c0_5] : memref<1x1xf32, #tpu.memory_space<smem>>
    %9 = vector.broadcast %8 : f32 to vector<8x128xf32>
    %10 = arith.addf %7, %9 : vector<8x128xf32>
    %c0_6 = arith.constant 0 : index
    %c0_7 = arith.constant 0 : index
    %11 = vector.load %arg7[%c0_6, %c0_7] : memref<8x128xf32, #tpu.memory_space<vmem>>, vector<8x128xf32>
    tpu.vector_store %arg7[%c0_6, %c0_7], %10 {strides = array<i32>} : memref<8x128xf32, #tpu.memory_space<vmem>>, vector<8x128xf32>,
    return
  }
  func.func @transform_0(%arg0: i32, %arg1: i32) -> (i32, i32) {
    %c0_i32 = arith.constant 0 : i32
    %c0_i32_0 = arith.constant 0 : i32
    return %arg0, %c0_i32 : i32, i32
  }
  func.func @transform_1(%arg0: i32, %arg1: i32) -> (i32, i32) {
    %c0_i32 = arith.constant 0 : i32
    %c0_i32_0 = arith.constant 0 : i32
    return %c0_i32, %arg1 : i32, i32
  }
  func.func @transform_2(%arg0: i32, %arg1: i32) -> (i32, i32) {
    %c0_i32 = arith.constant 0 : i32
    %c0_i32_0 = arith.constant 0 : i32
    %c0_i32_1 = arith.constant 0 : i32
    return %c0_i32, %c0_i32_0 : i32, i32
  }
  func.func @transform_3(%arg0: i32, %arg1: i32) -> (i32, i32) {
    %c0_i32 = arith.constant 0 : i32
    %c0_i32_0 = arith.constant 0 : i32
    %c0_i32_1 = arith.constant 0 : i32
    return %c0_i32, %c0_i32_0 : i32, i32
  }
  func.func @transform_4(%arg0: i32, %arg1: i32) -> (i32, i32) {
    %c0_i32 = arith.constant 0 : i32
    %c0_i32_0 = arith.constant 0 : i32
    %c0_i32_1 = arith.constant 0 : i32
    return %c0_i32, %c0_i32_0 : i32, i32
  }
  func.func @transform_5(%arg0: i32, %arg1: i32) -> (i32, i32) {
    %c0_i32 = arith.constant 0 : i32
    return %arg0, %arg1 : i32, i32
  }
}

</mosaic_0001>

<bundles_post_ra>
// kernel: tpu_custom_call.1
= control target key start
LH: loop header
LB: loop body
LE: loop exit
PB: predicated region body
PF: predicated region fallthrough
CT: control target
= control target key end

     0   :  { %s164_s0 = inlined_call_operand.vmem [shape: f32[8,4], index: 0, kind: input, shape index: {}]   ;;  %s165_s1 = inlined_call_operand.vmem [shape: f32[1,128], index: 1, kind: input, shape index: {}]   ;;  %s166_s2 = inlined_call_operand.vmem [shape: f32[1,4], index: 2, kind: input, shape index: {}]   ;;  %s167_s3 = inlined_call_operand.<no memory space> [shape: f32[1,1], index: 3, kind: input, shape index: {}]   ;;  %s168_s4 = inlined_call_operand.<no memory space> [shape: f32[1,1], index: 4, kind: input, shape index: {}]   ;;  %s169_s5 = inlined_call_operand.hbm [shape: f32[8,8], index: 5, kind: output, shape index: {}]  }
   0x1   :  { %v27_v0 = vld [vmem:[%s164_s0] sm:$0xff] }
   0x2   :  { %v29_v1 = vand.u32 2147483647, %v27_v0 }
   0x3   :  { %12 = vsyncpa [#allocation6], 0  ;;  %v82_v3 = vld [vmem:[%s166_s2] ss:$0 sm:$0xff]  ;;  %vm37_vm0 = vcmask 31744   ;;  %v114_v8 = vmov 0   ;;  %v44_v11 = vstv %s167_s3  ;;  %v60_v16 = vstv %s168_s4 }
   0x4   :  { %v30_v2 = vmax.f32 %v29_v1, 1e-07  ;;  %81 = vset.pattern.permute.xlu0 %v114_v8  ;;  %vm46_vm1 = vcmask 7168   ;;  %v83_v15 = vld [vmem:[%s165_s1] ss:$0 sm:$0xff]  ;;  %s115_s26 = smov [#allocation5]  }
   0x5   :  { %s68_s27 = sshll.u32 %s115_s26, 4  ;;  %s70_s3 = sshll.u32 %s169_s5, 4  ;;  %s69_s27 = int_to_ptr.vmem [resolvable:$true] %s68_s27  ;;  %s71_s3 = int_to_ptr.hbm [resolvable:$true] %s70_s3 }
   0x6   :  { %84 = vlog2.f32 %v30_v2 }
   0xc   :  { %v85_v4 = vpop.eup %84 }
   0xd   :  { %v32_v5 = vmul.f32 0.6931472, %v85_v4 }
   0xf   :  { %v36_v6 = vmul.f32 %v82_v3, %v32_v5 }
  0x11   :  { %v38_v7 = vsel %vm37_vm0, %v36_v6, 0.0 }
  0x12   :  { %39 = vadd.xlane.f32.xlu0 %v38_v7 }
  0x85   :  { %v40_v9 = vpop.xlane.xlu0 %39 }
  0x86   :  { %v41_v10 = vmul.f32 1.442695, %v40_v9 }
  0x88   :  { %86 = vpow2.f32 %v41_v10 }
  0x8e   :  { %v87_v12 = vpop.eup %86 }
  0x8f   :  { %v45_v13 = vsub.f32 %v87_v12, %v44_v11 }
  0x91   :  { %47 = vst.msk [vmem:[#allocation2] sm:$0xff] %vm46_vm1, %v45_v13 }
  0x98   :  { %v48_v14 = vld [vmem:[#allocation2] sm:$0xff] }
  0x99   :  { %52 = vperm.xlu0 %81, %v48_v14  }
 0x10b   :  { %v53_v17 = vpop.permute.xlu0 %52 }
 0x10c   :  { %v58_v18 = vmul.f32 %v83_v15, %v53_v17 }
 0x10e   :  { %v61_v19 = vadd.f32 %v60_v16, %v58_v18 }
 0x110   :  { %62 = vst [vmem:[#allocation5] sm:$0xff] %v61_v19 }
 0x111   :  { %73 = dma.vmem_to_hbm [thread:$0]  %s69_s27, 128, %s71_s3, [#allocation6]  }
 0x112   :  { %112 = dma.done.wait [#allocation6], 128  }
 0x113   :  { %113 = vsyncadd [#allocation6], 4294967168 }
 0x114   :  { %78 = vsyncpa [#allocation6], 1 }

</bundles_post_ra>
